<compile_context>
chip_gen: v7x
topology: tpu7x:2x2x1
jax: 0.10.0
libtpu: 0.0.40
codegen_flags: <defaults>
</compile_context>

<pallas_src>
import functools

import jax
import jax.numpy as jnp
from jax.experimental import pallas as pl
from jax.experimental.pallas import tpu as pltpu


HIDDEN = 128                       # hidden width fixed by the PyTorch module
_VMEM_ACT_BUDGET = 24 * 1024 * 1024  # cap for double-buffered activation tiles (v7x-safe)


def _round_up(x, m):
    return ((x + m - 1) // m) * m


def autoencoder_kernel(x_ref,
                       w1_ref, b1_ref,
                       w23_ref, b23_ref,
                       w4_ref, b4_ref,
                       out_ref):
    """One batch tile of the fused forward pass.

    h1    = relu(x  @ w1  + b1)        # encoder layer 1
    h2    = relu(h1 @ w23 + b23)       # fused: encoder layer 2 + decoder layer 1
    x_hat =       h2 @ w4  + b4        # decoder layer 2

    Matmul inputs are bf16 (MXU peak path), accumulation + bias/ReLU epilogues are f32.
    """
    x = x_ref[...].astype(jnp.bfloat16)                           # (TB, D_pad)

    h1 = jnp.dot(x, w1_ref[...], preferred_element_type=jnp.float32) + b1_ref[...]
    h1 = jnp.maximum(h1, 0.0).astype(jnp.bfloat16)                # (TB, 128)

    h2 = jnp.dot(h1, w23_ref[...], preferred_element_type=jnp.float32) + b23_ref[...]
    h2 = jnp.maximum(h2, 0.0).astype(jnp.bfloat16)                # (TB, 128)

    x_hat = jnp.dot(h2, w4_ref[...], preferred_element_type=jnp.float32) + b4_ref[...]
    out_ref[...] = x_hat.astype(out_ref.dtype)                    # (TB, D_pad)


def prepare_params(params, input_dim):
    """One-time prep: pad feature dims to 128 lanes, cast weights to bf16, and fuse
    the two middle linears (W23 = w2 @ w3, b23 = b2 @ w3 + b3). Call once, reuse."""
    bf16, f32 = jnp.bfloat16, jnp.float32
    D = input_dim
    D_pad = _round_up(D, 128)
    hidden = params["w1"].shape[1]

    w1 = jnp.zeros((D_pad, hidden), bf16).at[:D, :].set(params["w1"].astype(bf16))
    b1 = params["b1"].astype(f32).reshape(1, hidden)

    w23_f32 = params["w2"] @ params["w3"]                        # (hidden, hidden), exact fusion
    b23_f32 = params["b2"] @ params["w3"] + params["b3"]         # (1, hidden)
    w23 = w23_f32.astype(bf16)
    b23 = b23_f32.astype(f32).reshape(1, hidden)

    w4 = jnp.zeros((hidden, D_pad), bf16).at[:, :D].set(params["w4"].astype(bf16))
    b4 = jnp.zeros((1, D_pad), f32).at[:, :D].set(params["b4"].astype(f32).reshape(1, D))

    return {"w1": w1, "b1": b1, "w23": w23, "b23": b23, "w4": w4, "b4": b4}


def _choose_batch_tile(B, D_pad, block_batch, out_itemsize):
    B_128 = _round_up(B, 128)
    TB = min(block_batch, B_128)
    # Keep >= 2 grid steps when possible so v7x megacore can split the batch axis.
    if B_128 >= 256:
        TB = min(TB, (B_128 // 2) // 128 * 128)
    # Keep the double-buffered (in + out) activation tiles within the VMEM budget
    # (conservatively assume f32 input) so large input_dim still fits v7x's 64 MiB.
    per_row = 2 * D_pad * (4 + out_itemsize)
    TB = min(TB, max(128, (_VMEM_ACT_BUDGET // per_row) // 128 * 128))
    return max(TB, 128)


@functools.partial(jax.jit, static_argnames=("block_batch", "out_dtype"))
def autoencoder_forward(x, prepared, block_batch=512, out_dtype=jnp.bfloat16):
    """x: (B, D) float32. `prepared`: output of prepare_params (padded bf16 weights)."""
    B, D = x.shape
    D_pad = prepared["w4"].shape[1]
    out_itemsize = jnp.dtype(out_dtype).itemsize

    TB = _choose_batch_tile(B, D_pad, block_batch, out_itemsize)
    B_pad = _round_up(B, TB)
    n_tiles = B_pad // TB

    needs_pad = (B_pad != B) or (D_pad != D)
    if needs_pad:
        # Zero padding is mathematically a no-op (padded w1 rows are also zero);
        # pad+cast in one fused op so the kernel reads lane-dense bf16 tiles.
        x_in = jnp.zeros((B_pad, D_pad), jnp.bfloat16).at[:B, :D].set(x.astype(jnp.bfloat16))
    else:
        x_in = x  # cast to bf16 inside the kernel; no extra HBM round trip.

    # Activation tiles walk the batch axis; weights/biases use constant index_maps
    # (block index never changes -> DMA'd from HBM once, VMEM-resident across tiles).
    act_in_spec = pl.BlockSpec((TB, D_pad), lambda i: (i, 0))
    act_out_spec = pl.BlockSpec((TB, D_pad), lambda i: (i, 0))

    def const_spec(shape):
        return pl.BlockSpec(shape, lambda i: (0, 0))

    weight_args = (prepared["w1"], prepared["b1"],
                   prepared["w23"], prepared["b23"],
                   prepared["w4"], prepared["b4"])
    weight_specs = [const_spec(a.shape) for a in weight_args]

    # Advisory cost estimate on real (unpadded) dims: 3 matmuls D->128, 128->128, 128->D.
    hidden = prepared["w1"].shape[1]
    flops = 2 * B * hidden * (D + hidden + D)
    bytes_accessed = (x.size * x.dtype.itemsize + B * D * out_itemsize
                      + sum(int(a.size) * a.dtype.itemsize for a in weight_args))

    out = pl.pallas_call(
        autoencoder_kernel,
        out_shape=jax.ShapeDtypeStruct((B_pad, D_pad), out_dtype),
        grid=(n_tiles,),
        in_specs=[act_in_spec] + weight_specs,
        out_specs=act_out_spec,
        compiler_params=pltpu.CompilerParams(
            dimension_semantics=("parallel",),       # megacore split on v7x
            vmem_limit_bytes=32 * 1024 * 1024,       # above v5e default, headroom on v7x
        ),
        cost_estimate=pl.CostEstimate(
            flops=flops, bytes_accessed=bytes_accessed, transcendentals=0),
    )(x_in, *weight_args)

    if needs_pad:
        out = out[:B, :D]
    return out


def init_params(key, input_dim, latent_dim=32, hidden=HIDDEN):
    """PyTorch nn.Linear-style init (uniform +/- 1/sqrt(fan_in)).

    Weights stored transposed: (in_features, out_features). Biases: (1, out_features).
    """
    dims = [(input_dim, hidden), (hidden, latent_dim),
            (latent_dim, hidden), (hidden, input_dim)]
    params = {}
    keys = jax.random.split(key, 2 * len(dims))
    for i, (fan_in, fan_out) in enumerate(dims):
        bound = 1.0 / jnp.sqrt(jnp.float32(fan_in))
        params[f"w{i + 1}"] = jax.random.uniform(
            keys[2 * i], (fan_in, fan_out), minval=-bound, maxval=bound, dtype=jnp.float32)
        params[f"b{i + 1}"] = jax.random.uniform(
            keys[2 * i + 1], (1, fan_out), minval=-bound, maxval=bound, dtype=jnp.float32)
    return params


def autoencoder_reference(x, params):
    """Pure-JAX f32 reference matching the PyTorch module's forward (unfused)."""
    h = jnp.maximum(x @ params["w1"] + params["b1"], 0.0)
    z = h @ params["w2"] + params["b2"]
    h2 = jnp.maximum(z @ params["w3"] + params["b3"], 0.0)
    return h2 @ params["w4"] + params["b4"]


if __name__ == "__main__":
    key = jax.random.PRNGKey(0)
    k_x, k_p = jax.random.split(key)

    batch = 512          # 2 grid tiles of 256 rows -> both v7x TensorCores busy
    input_dim = 64       # padded to 128 lanes inside the wrapper
    latent_dim = 32      # fused away (W23 = w2 @ w3), never 4x-padded at runtime

    x = jax.random.normal(k_x, (batch, input_dim), dtype=jnp.float32)
    params = init_params(k_p, input_dim, latent_dim)
    prepared = prepare_params(params, input_dim)   # one-time pad / cast / fuse

    x_hat = autoencoder_forward(x, prepared)
    x_hat = jax.block_until_ready(x_hat)

    assert x_hat.shape == (batch, input_dim)
    assert x_hat.dtype == jnp.bfloat16

    # bf16 matmul inputs + bf16 output vs the f32 PyTorch-equivalent reference:
    # only bf16 rounding error away (inference-parity tolerance).
    ref = autoencoder_reference(x, params)
    assert jnp.allclose(x_hat.astype(jnp.float32), ref, atol=5e-2, rtol=5e-2), \
        "mismatch vs f32 reference"

    print("KERNEL_OK")
</pallas_src>

<mosaic_0001>
module attributes {stable_mosaic.version = 11 : i64} {
  func.func @autoencoder_kernel(%arg0: i32, %arg1: memref<256x128xbf16, #tpu.memory_space<vmem>>, %arg2: memref<128x128xbf16, #tpu.memory_space<vmem>>, %arg3: memref<1x128xf32, #tpu.memory_space<vmem>>, %arg4: memref<128x128xbf16, #tpu.memory_space<vmem>>, %arg5: memref<1x128xf32, #tpu.memory_space<vmem>>, %arg6: memref<128x128xbf16, #tpu.memory_space<vmem>>, %arg7: memref<1x128xf32, #tpu.memory_space<vmem>>, %arg8: memref<256x128xbf16, #tpu.memory_space<vmem>>) attributes {dimension_semantics = [#tpu.dimension_semantics<parallel>], iteration_bounds = array<i64: 2>, scalar_prefetch = 0 : i64, scratch_operands = 0 : i64, tpu.core_type = #tpu.core_type<tc>, window_params = [{transform_indices = @transform_0, window_bounds = array<i64: 256, 128>}, {pipeline_mode = #tpu.pipeline_mode<synchronous>, transform_indices = @transform_1, window_bounds = array<i64: 128, 128>}, {pipeline_mode = #tpu.pipeline_mode<synchronous>, transform_indices = @transform_2, window_bounds = array<i64: 1, 128>}, {pipeline_mode = #tpu.pipeline_mode<synchronous>, transform_indices = @transform_3, window_bounds = array<i64: 128, 128>}, {pipeline_mode = #tpu.pipeline_mode<synchronous>, transform_indices = @transform_4, window_bounds = array<i64: 1, 128>}, {pipeline_mode = #tpu.pipeline_mode<synchronous>, transform_indices = @transform_5, window_bounds = array<i64: 128, 128>}, {pipeline_mode = #tpu.pipeline_mode<synchronous>, transform_indices = @transform_6, window_bounds = array<i64: 1, 128>}, {transform_indices = @transform_7, window_bounds = array<i64: 256, 128>}]} {
    %c0 = arith.constant 0 : index
    %c0_0 = arith.constant 0 : index
    %0 = vector.load %arg1[%c0, %c0_0] : memref<256x128xbf16, #tpu.memory_space<vmem>>, vector<256x128xbf16>
    %c0_1 = arith.constant 0 : index
    %c0_2 = arith.constant 0 : index
    %1 = vector.load %arg2[%c0_1, %c0_2] : memref<128x128xbf16, #tpu.memory_space<vmem>>, vector<128x128xbf16>
    %cst = arith.constant dense<0.000000e+00> : vector<256x128xf32>
    %2 = tpu.matmul %0, %1, %cst {dimension_numbers = #tpu.dot_dimension_numbers<[1], [0], [0], [1], [0, 0, 1, 1], [], []>} : vector<256x128xbf16>, vector<128x128xbf16>, vector<256x128xf32> -> vector<256x128xf32>
    %c0_3 = arith.constant 0 : index
    %c0_4 = arith.constant 0 : index
    %3 = vector.load %arg3[%c0_3, %c0_4] : memref<1x128xf32, #tpu.memory_space<vmem>>, vector<1x128xf32>
    %4 = vector.broadcast %3 : vector<1x128xf32> to vector<256x128xf32>
    %5 = arith.addf %2, %4 : vector<256x128xf32>
    %cst_5 = arith.constant 0.000000e+00 : f32
    %6 = vector.broadcast %cst_5 : f32 to vector<256x128xf32>
    %7 = arith.maximumf %5, %6 : vector<256x128xf32>
    %8 = arith.truncf %7 : vector<256x128xf32> to vector<256x128xbf16>
    %c0_6 = arith.constant 0 : index
    %c0_7 = arith.constant 0 : index
    %9 = vector.load %arg4[%c0_6, %c0_7] : memref<128x128xbf16, #tpu.memory_space<vmem>>, vector<128x128xbf16>
    %cst_8 = arith.constant dense<0.000000e+00> : vector<256x128xf32>
    %10 = tpu.matmul %8, %9, %cst_8 {dimension_numbers = #tpu.dot_dimension_numbers<[1], [0], [0], [1], [0, 0, 1, 1], [], []>} : vector<256x128xbf16>, vector<128x128xbf16>, vector<256x128xf32> -> vector<256x128xf32>
    %c0_9 = arith.constant 0 : index
    %c0_10 = arith.constant 0 : index
    %11 = vector.load %arg5[%c0_9, %c0_10] : memref<1x128xf32, #tpu.memory_space<vmem>>, vector<1x128xf32>
    %12 = vector.broadcast %11 : vector<1x128xf32> to vector<256x128xf32>
    %13 = arith.addf %10, %12 : vector<256x128xf32>
    %cst_11 = arith.constant 0.000000e+00 : f32
    %14 = vector.broadcast %cst_11 : f32 to vector<256x128xf32>
    %15 = arith.maximumf %13, %14 : vector<256x128xf32>
    %16 = arith.truncf %15 : vector<256x128xf32> to vector<256x128xbf16>
    %c0_12 = arith.constant 0 : index
    %c0_13 = arith.constant 0 : index
    %17 = vector.load %arg6[%c0_12, %c0_13] : memref<128x128xbf16, #tpu.memory_space<vmem>>, vector<128x128xbf16>
    %cst_14 = arith.constant dense<0.000000e+00> : vector<256x128xf32>
    %18 = tpu.matmul %16, %17, %cst_14 {dimension_numbers = #tpu.dot_dimension_numbers<[1], [0], [0], [1], [0, 0, 1, 1], [], []>} : vector<256x128xbf16>, vector<128x128xbf16>, vector<256x128xf32> -> vector<256x128xf32>
    %c0_15 = arith.constant 0 : index
    %c0_16 = arith.constant 0 : index
    %19 = vector.load %arg7[%c0_15, %c0_16] : memref<1x128xf32, #tpu.memory_space<vmem>>, vector<1x128xf32>
    %20 = vector.broadcast %19 : vector<1x128xf32> to vector<256x128xf32>
    %21 = arith.addf %18, %20 : vector<256x128xf32>
    %22 = arith.truncf %21 : vector<256x128xf32> to vector<256x128xbf16>
    %c0_17 = arith.constant 0 : index
    %c0_18 = arith.constant 0 : index
    %23 = vector.load %arg8[%c0_17, %c0_18] : memref<256x128xbf16, #tpu.memory_space<vmem>>, vector<256x128xbf16>
    tpu.vector_store %arg8[%c0_17, %c0_18], %22 {strides = array<i32>} : memref<256x128xbf16, #tpu.memory_space<vmem>>, vector<256x128xbf16>,
    return
  }
  func.func @transform_0(%arg0: i32) -> (i32, i32) {
    %c0_i32 = arith.constant 0 : i32
    %c0_i32_0 = arith.constant 0 : i32
    return %arg0, %c0_i32 : i32, i32
  }
  func.func @transform_1(%arg0: i32) -> (i32, i32) {
    %c0_i32 = arith.constant 0 : i32
    %c0_i32_0 = arith.constant 0 : i32
    %c0_i32_1 = arith.constant 0 : i32
    return %c0_i32, %c0_i32_0 : i32, i32
  }
  func.func @transform_2(%arg0: i32) -> (i32, i32) {
    %c0_i32 = arith.constant 0 : i32
    %c0_i32_0 = arith.constant 0 : i32
    %c0_i32_1 = arith.constant 0 : i32
    return %c0_i32, %c0_i32_0 : i32, i32
  }
  func.func @transform_3(%arg0: i32) -> (i32, i32) {
    %c0_i32 = arith.constant 0 : i32
    %c0_i32_0 = arith.constant 0 : i32
    %c0_i32_1 = arith.constant 0 : i32
    return %c0_i32, %c0_i32_0 : i32, i32
  }
  func.func @transform_4(%arg0: i32) -> (i32, i32) {
    %c0_i32 = arith.constant 0 : i32
    %c0_i32_0 = arith.constant 0 : i32
    %c0_i32_1 = arith.constant 0 : i32
    return %c0_i32, %c0_i32_0 : i32, i32
  }
  func.func @transform_5(%arg0: i32) -> (i32, i32) {
    %c0_i32 = arith.constant 0 : i32
    %c0_i32_0 = arith.constant 0 : i32
    %c0_i32_1 = arith.constant 0 : i32
    return %c0_i32, %c0_i32_0 : i32, i32
  }
  func.func @transform_6(%arg0: i32) -> (i32, i32) {
    %c0_i32 = arith.constant 0 : i32
    %c0_i32_0 = arith.constant 0 : i32
    %c0_i32_1 = arith.constant 0 : i32
    return %c0_i32, %c0_i32_0 : i32, i32
  }
  func.func @transform_7(%arg0: i32) -> (i32, i32) {
    %c0_i32 = arith.constant 0 : i32
    %c0_i32_0 = arith.constant 0 : i32
    return %arg0, %c0_i32 : i32, i32
  }
}

</mosaic_0001>

<bundles_post_ra>
// kernel: autoencoder_forward.1
= control target key start
LH: loop header
LB: loop body
LE: loop exit
PB: predicated region body
PF: predicated region fallthrough
CT: control target
= control target key end

     0   :  { %s1960_s24 = smov 0   ;;  %s2215_s0 = inlined_call_operand.vmem [shape: bf16[512,128], index: 0, kind: input, shape index: {}]   ;;  %s2216_s1 = inlined_call_operand.vmem [shape: bf16[128,128], index: 1, kind: input, shape index: {}]   ;;  %s2217_s2 = inlined_call_operand.vmem [shape: f32[1,128], index: 2, kind: input, shape index: {}]   ;;  %s2218_s3 = inlined_call_operand.vmem [shape: bf16[128,128], index: 3, kind: input, shape index: {}]   ;;  %s2219_s4 = inlined_call_operand.vmem [shape: f32[1,128], index: 4, kind: input, shape index: {}]   ;;  %s2220_s5 = inlined_call_operand.vmem [shape: bf16[128,128], index: 5, kind: input, shape index: {}]   ;;  %s2221_s6 = inlined_call_operand.vmem [shape: f32[1,128], index: 6, kind: input, shape index: {}]   ;;  %s2222_s7 = inlined_call_operand.vmem [shape: bf16[512,128], index: 7, kind: output, shape index: {}]  }
   0x1 LB: > { %s1419_s25 = sadd.s32 4294967295, %s1918_s24   ;;  %p1423_p0 = scmp.ge.s32.totalorder %s1918_s24, 1  ;;  %s1918_s24 = sphi %s1960_s24, %s17_s24  }
   0x2   : > { %p238_p1 = scmp.lt.s32.totalorder %s1918_s24, 3 }
   0x4   : > { %p239_p2 = pnand %p1423_p0, %p238_p1 }
   0x5   : > { %v1872_v0 = vld [vmem:[%s2216_s1] sm:$0xff] (!%p239_p2)   ;;  %s1424_s28 = sshll.u32 (!%p239_p2), %s1419_s25, 5  ;;  %v1873_v1 = vld [vmem:[%s2216_s1 + $0x8] sm:$0xff] (!%p239_p2)   ;;  %v1874_v2 = vld [vmem:[%s2216_s1 + $0x10] sm:$0xff] (!%p239_p2)  }
   0x6   : > { %242 = sbr.rel (%p239_p2) target bundleno = 758 (0x2f6), region = 48  ;;  %p271_p3 = scmp.lt.s32.totalorder (!%p239_p2), %s1424_s28, 63  ;;  %1704 = vmatprep.subr.bf16.mxu0 (!%p239_p2), %v1872_v0  ;;  %1848 = vmatprep.subr.bf16.mxu1 (!%p239_p2), %v1872_v0  ;;  %v1875_v3 = vld [vmem:[%s2216_s1 + $0x18] sm:$0xff] (!%p239_p2)   ;;  %v1876_v5 = vld [vmem:[%s2216_s1 + $0x20] sm:$0xff] (!%p239_p2)   ;;  %v1877_v6 = vld [vmem:[%s2216_s1 + $0x28] sm:$0xff] (!%p239_p2)  }
   0x7   : > { %1705 = vmatpush3.bf16.msra.mxu0 (!%p239_p2), %v1872_v0  ;;  %1856 = vmatpush3.bf16.msra.mxu1 (!%p239_p2), %v1872_v0  ;;  %v1878_v8 = vld [vmem:[%s2216_s1 + $0x30] sm:$0xff] (!%p239_p2)   ;;  %v1879_v9 = vld [vmem:[%s2216_s1 + $0x38] sm:$0xff] (!%p239_p2)   ;;  %v1896_v12 = vld [vmem:[%s2218_s3] sm:$0xff] (!%p239_p2)  }
   0x8   : > { %1706 = vmatprep.subr.bf16.mxu0 (!%p239_p2), %v1873_v1  ;;  %1849 = vmatprep.subr.bf16.mxu1 (!%p239_p2), %v1873_v1  ;;  %v1897_v15 = vld [vmem:[%s2218_s3 + $0x8] sm:$0xff] (!%p239_p2)   ;;  %v1898_v16 = vld [vmem:[%s2218_s3 + $0x10] sm:$0xff] (!%p239_p2)   ;;  %v1899_v21 = vld [vmem:[%s2218_s3 + $0x18] sm:$0xff] (!%p239_p2)  }
   0x9   : > { %v1900_v22 = vld [vmem:[%s2218_s3 + $0x20] sm:$0xff] (!%p239_p2)   ;;  %v1901_v27 = vld [vmem:[%s2218_s3 + $0x28] sm:$0xff] (!%p239_p2)   ;;  %v1902_v30 = vld [vmem:[%s2218_s3 + $0x30] sm:$0xff] (!%p239_p2)  }
   0xa   : > { %v1903_v31 = vld [vmem:[%s2218_s3 + $0x38] sm:$0xff] (!%p239_p2)   ;;  %v1904_v32 = vld [vmem:[%s2220_s5] sm:$0xff] (!%p239_p2)   ;;  %v1905_v33 = vld [vmem:[%s2220_s5 + $0x8] sm:$0xff] (!%p239_p2)  }
   0xb   : > { %1707 = vmatpush3.bf16.msra.mxu0 (!%p239_p2), %v1873_v1  ;;  %1857 = vmatpush3.bf16.msra.mxu1 (!%p239_p2), %v1873_v1  ;;  %v1906_v34 = vld [vmem:[%s2220_s5 + $0x10] sm:$0xff] (!%p239_p2)   ;;  %v1907_v35 = vld [vmem:[%s2220_s5 + $0x18] sm:$0xff] (!%p239_p2)   ;;  %v1908_v36 = vld [vmem:[%s2220_s5 + $0x20] sm:$0xff] (!%p239_p2)  }
   0xc   : > { %1708 = vmatprep.subr.bf16.mxu0 (!%p239_p2), %v1874_v2  ;;  %1850 = vmatprep.subr.bf16.mxu1 (!%p239_p2), %v1874_v2  ;;  %v1909_v37 = vld [vmem:[%s2220_s5 + $0x28] sm:$0xff] (!%p239_p2)   ;;  %v2063_v38 = vld [vmem:[%s2217_s2] ss:$0 sm:$0xff] (!%p239_p2) }
   0xd   : > { %s2224_s28 = smov (!%p271_p3, %s1424_s28), 63 }
   0xe   : > { %s1425_s10 = sshll.u32 %s2224_s28, 2 }
   0xf   : > { %s1985_s13 = scalar_lea.vmem %s2215_s0, %s1425_s10  ;;  %1709 = vmatpush3.bf16.msra.mxu0 %v1874_v2  ;;  %1858 = vmatpush3.bf16.msra.mxu1 %v1874_v2  ;;  %s2165_s25 = scalar_lea.vmem %s2222_s7, %s1425_s10 }
  0x10   : > { %v1880_v4 = vld [vmem:[%s1985_s13] sm:$0xff]   ;;  %1710 = vmatprep.subr.bf16.mxu0 %v1875_v3  ;;  %1851 = vmatprep.subr.bf16.mxu1 %v1875_v3  ;;  %v1881_v10 = vld [vmem:[%s1985_s13 + $0x8] sm:$0xff]   ;;  %v1882_v13 = vld [vmem:[%s1985_s13 + $0x10] sm:$0xff]  }
  0x11   : > { %1720 = vmatprep.mubr.bf16.mxu0 %v1880_v4  ;;  %v1888_v7 = vld [vmem:[%s1985_s13 + $0x40] sm:$0xff]   ;;  %v1889_v11 = vld [vmem:[%s1985_s13 + $0x48] sm:$0xff]   ;;  %v1890_v14 = vld [vmem:[%s1985_s13 + $0x50] sm:$0xff]  }
  0x12   : > { %1736 = vmatprep.mubr.bf16.mxu1 %v1888_v7  ;;  %v1883_v17 = vld [vmem:[%s1985_s13 + $0x18] sm:$0xff]   ;;  %v1884_v19 = vld [vmem:[%s1985_s13 + $0x20] sm:$0xff]   ;;  %v1885_v23 = vld [vmem:[%s1985_s13 + $0x28] sm:$0xff]  }
  0x13   : > { %1711 = vmatpush3.bf16.msra.mxu0 %v1875_v3  ;;  %1859 = vmatpush3.bf16.msra.mxu1 %v1875_v3  ;;  %v1891_v18 = vld [vmem:[%s1985_s13 + $0x58] sm:$0xff]   ;;  %v1892_v20 = vld [vmem:[%s1985_s13 + $0x60] sm:$0xff]   ;;  %v1893_v24 = vld [vmem:[%s1985_s13 + $0x68] sm:$0xff]  }
  0x14   : > { %1712 = vmatprep.subr.bf16.mxu0 %v1876_v5  ;;  %1852 = vmatprep.subr.bf16.mxu1 %v1876_v5  ;;  %v1886_v25 = vld [vmem:[%s1985_s13 + $0x30] sm:$0xff]   ;;  %v1887_v28 = vld [vmem:[%s1985_s13 + $0x38] sm:$0xff]  }
  0x15   : > { %v1894_v26 = vld [vmem:[%s1985_s13 + $0x70] sm:$0xff]   ;;  %v1895_v29 = vld [vmem:[%s1985_s13 + $0x78] sm:$0xff]  }
  0x17   : > { %1713 = vmatpush3.bf16.msra.mxu0 %v1876_v5  ;;  %1860 = vmatpush3.bf16.msra.mxu1 %v1876_v5 }
  0x18   : > { %1714 = vmatprep.subr.bf16.mxu0 %v1877_v6  ;;  %1853 = vmatprep.subr.bf16.mxu1 %v1877_v6 }
  0x1b   : > { %1715 = vmatpush3.bf16.msra.mxu0 %v1877_v6  ;;  %1861 = vmatpush3.bf16.msra.mxu1 %v1877_v6 }
  0x1c   : > { %1716 = vmatprep.subr.bf16.mxu0 %v1878_v8  ;;  %1854 = vmatprep.subr.bf16.mxu1 %v1878_v8 }
  0x1f   : > { %1717 = vmatpush3.bf16.msra.mxu0 %v1878_v8  ;;  %1862 = vmatpush3.bf16.msra.mxu1 %v1878_v8 }
  0x20   : > { %1718 = vmatprep.subr.bf16.mxu0 %v1879_v9  ;;  %1855 = vmatprep.subr.bf16.mxu1 %v1879_v9 }
  0x23   : > { %1719 = vmatpush3.bf16.msra.mxu0 %v1879_v9  ;;  %1863 = vmatpush3.bf16.msra.mxu1 %v1879_v9 }
  0x24   : > { %1752 = vmatprep.subr.bf16.mxu1 %v1896_v12  ;;  %1800 = vmatprep.subr.bf16.mxu0 %v1904_v32 }
  0x26   : > { %1721 = vmatmul.mubr.bf16.vlgmr.msra.gmra.mrb[0].mxu0 %v1881_v10  ;;  %1737 = vmatmul.mubr.bf16.vlgmr.msra.gmra.mrb[0].mxu1 %v1889_v11 }
  0x27   : > { %1724 = vmatprep.mubr.bf16.mxu0 %v1882_v13  ;;  %1740 = vmatprep.mubr.bf16.mxu1 %v1890_v14 }
  0x28   : > { %1753 = vmatpush3.bf16.msra.mxu1 %v1896_v12  ;;  %1801 = vmatpush3.bf16.msra.mxu0 %v1904_v32 }
  0x29   : > { %1754 = vmatprep.subr.bf16.mxu1 %v1897_v15  ;;  %1802 = vmatprep.subr.bf16.mxu0 %v1905_v33 }
  0x2c   : > { %1755 = vmatpush3.bf16.msra.mxu1 %v1897_v15  ;;  %1803 = vmatpush3.bf16.msra.mxu0 %v1905_v33 }
  0x2d   : > { %1756 = vmatprep.subr.bf16.mxu1 %v1898_v16  ;;  %1804 = vmatprep.subr.bf16.mxu0 %v1906_v34 }
  0x2e   : > { %1725 = vmatmul.mubr.bf16.gmra.mrb[4].mxu0 %v1883_v17  ;;  %1741 = vmatmul.mubr.bf16.gmra.mrb[4].mxu1 %v1891_v18 }
  0x2f   : > { %1728 = vmatprep.mubr.bf16.mxu0 %v1884_v19  ;;  %1744 = vmatprep.mubr.bf16.mxu1 %v1892_v20 }
  0x30   : > { %1757 = vmatpush3.bf16.msra.mxu1 %v1898_v16  ;;  %1805 = vmatpush3.bf16.msra.mxu0 %v1906_v34 }
  0x31   : > { %1758 = vmatprep.subr.bf16.mxu1 %v1899_v21  ;;  %1806 = vmatprep.subr.bf16.mxu0 %v1907_v35 }
  0x34   : > { %1759 = vmatpush3.bf16.msra.mxu1 %v1899_v21  ;;  %1807 = vmatpush3.bf16.msra.mxu0 %v1907_v35 }
  0x35   : > { %1760 = vmatprep.subr.bf16.mxu1 %v1900_v22  ;;  %1808 = vmatprep.subr.bf16.mxu0 %v1908_v36 }
  0x36   : > { %1729 = vmatmul.mubr.bf16.gmra.mrb[8].mxu0 %v1885_v23  ;;  %1745 = vmatmul.mubr.bf16.gmra.mrb[8].mxu1 %v1893_v24 }
  0x37   : > { %1732 = vmatprep.mubr.bf16.mxu0 %v1886_v25  ;;  %1748 = vmatprep.mubr.bf16.mxu1 %v1894_v26 }
  0x38   : > { %1761 = vmatpush3.bf16.msra.mxu1 %v1900_v22  ;;  %1809 = vmatpush3.bf16.msra.mxu0 %v1908_v36 }
  0x39   : > { %1762 = vmatprep.subr.bf16.mxu1 %v1901_v27  ;;  %1810 = vmatprep.subr.bf16.mxu0 %v1909_v37 }
  0x3c   : > { %1763 = vmatpush3.bf16.msra.mxu1 %v1901_v27  ;;  %1811 = vmatpush3.bf16.msra.mxu0 %v1909_v37 }
  0x3d   : > { %1764 = vmatprep.subr.bf16.mxu1 %v1902_v30 }
  0x3e   : > { %1733 = vmatmul.mubr.bf16.gmra.mrb[12].mxu0 %v1887_v28  ;;  %1749 = vmatmul.mubr.bf16.gmra.mrb[12].mxu1 %v1895_v29 }
  0x40   : > { %1765 = vmatpush3.bf16.msra.mxu1 %v1902_v30 }
  0x41   : > { %1766 = vmatprep.subr.bf16.mxu1 %v1903_v31 }
  0x44   : > { %1767 = vmatpush3.bf16.msra.mxu1 %v1903_v31 }
  0xf9   : > { %v1722_v39 = vpop.f32.mrb[0].mxu0  ;;  %v1738_v40 = vpop.f32.mrb[0].mxu1 }
  0xfa   : > { %v525_v41 = vadd.f32 %v1722_v39, %v2063_v38  ;;  %v516_v42 = vpop.f32.mrb[1].mxu0  ;;  %v589_v43 = vadd.f32 %v1738_v40, %v2063_v38  ;;  %v580_v44 = vpop.f32.mrb[1].mxu1 }
  0xfb   : > { %v517_v45 = vadd.f32 %v2063_v38, %v516_v42  ;;  %v1723_v46 = vpop.f32.mrb[2].mxu0  ;;  %v581_v47 = vadd.f32 %v2063_v38, %v580_v44  ;;  %v1739_v48 = vpop.f32.mrb[2].mxu1 }
  0xfc   : > { %v528_v49 = vadd.f32 %v1723_v46, %v2063_v38  ;;  %v519_v50 = vpop.f32.mrb[3].mxu0  ;;  %v661_v51 = vmax.f32 %v589_v43, 0.0  ;;  %v592_v52 = vadd.f32 %v1739_v48, %v2063_v38  ;;  %v583_v53 = vpop.f32.mrb[3].mxu1  ;;  %v645_v57 = vmax.f32 %v525_v41, 0.0 }
  0xfd   : > { %v520_v54 = vadd.f32 %v2063_v38, %v519_v50  ;;  %v659_v55 = vmax.f32 %v581_v47, 0.0  ;;  %v584_v56 = vadd.f32 %v2063_v38, %v583_v53  ;;  %v643_v60 = vmax.f32 %v517_v45, 0.0 }
  0xfe   : > { %v646_v58 = vmax.f32 %v528_v49, 0.0  ;;  %v662_v59 = vmax.f32 %v592_v52, 0.0 }
  0xff   : > { %v644_v61 = vmax.f32 %v520_v54, 0.0  ;;  %v660_v62 = vmax.f32 %v584_v56, 0.0 }
 0x100   : > { %v676_v63 = vpack.c.bf16 %v646_v58, %v645_v57  ;;  %v2073_v0 = vpack.c.bf16 %v662_v59, %v661_v51 }
 0x101   : > { %v675_v1 = vpack.c.bf16 %v644_v61, %v643_v60  ;;  %v1726_v2 = vpop.f32.mrb[4].mxu0  ;;  %v2075_v3 = vpack.c.bf16 %v660_v62, %v659_v55  ;;  %v1742_v4 = vpop.f32.mrb[4].mxu1 }
 0x102   : > { %v541_v5 = vadd.f32 %v1726_v2, %v2063_v38  ;;  %v532_v6 = vpop.f32.mrb[5].mxu0  ;;  %v605_v7 = vadd.f32 %v1742_v4, %v2063_v38  ;;  %v596_v8 = vpop.f32.mrb[5].mxu1 }
 0x103   : > { %v533_v9 = vadd.f32 %v2063_v38, %v532_v6  ;;  %v1727_v10 = vpop.f32.mrb[6].mxu0  ;;  %1768 = vmatprep.mubr.bf16.mxu1 %v675_v1  ;;  %v597_v11 = vadd.f32 %v2063_v38, %v596_v8  ;;  %v1743_v12 = vpop.f32.mrb[6].mxu1 }
 0x104   : > { %v544_v13 = vadd.f32 %v1727_v10, %v2063_v38  ;;  %v535_v14 = vpop.f32.mrb[7].mxu0  ;;  %1769 = vmatmul.mubr.bf16.vlgmr.msra.gmra.mrb[16].mxu1 %v676_v63  ;;  %v665_v15 = vmax.f32 %v605_v7, 0.0  ;;  %v608_v16 = vadd.f32 %v1743_v12, %v2063_v38  ;;  %v599_v17 = vpop.f32.mrb[7].mxu1  ;;  %v649_v21 = vmax.f32 %v541_v5, 0.0 }
 0x105   : > { %v536_v18 = vadd.f32 %v2063_v38, %v535_v14  ;;  %v663_v19 = vmax.f32 %v597_v11, 0.0  ;;  %v600_v20 = vadd.f32 %v2063_v38, %v599_v17  ;;  %v647_v24 = vmax.f32 %v533_v9, 0.0 }
 0x106   : > { %v650_v22 = vmax.f32 %v544_v13, 0.0  ;;  %v666_v23 = vmax.f32 %v608_v16, 0.0 }
 0x107   : > { %v648_v25 = vmax.f32 %v536_v18, 0.0  ;;  %v664_v26 = vmax.f32 %v600_v20, 0.0 }
 0x108   : > { %v678_v27 = vpack.c.bf16 %v650_v22, %v649_v21  ;;  %v2085_v28 = vpack.c.bf16 %v666_v23, %v665_v15 }
 0x109   : > { %v677_v29 = vpack.c.bf16 %v648_v25, %v647_v24  ;;  %v1730_v30 = vpop.f32.mrb[8].mxu0  ;;  %v2087_v31 = vpack.c.bf16 %v664_v26, %v663_v19  ;;  %v1746_v32 = vpop.f32.mrb[8].mxu1 }
 0x10a   : > { %v557_v33 = vadd.f32 %v1730_v30, %v2063_v38  ;;  %v548_v34 = vpop.f32.mrb[9].mxu0  ;;  %v621_v35 = vadd.f32 %v1746_v32, %v2063_v38  ;;  %v612_v36 = vpop.f32.mrb[9].mxu1 }
 0x10b   : > { %v549_v37 = vadd.f32 %v2063_v38, %v548_v34  ;;  %v1731_v39 = vpop.f32.mrb[10].mxu0  ;;  %1772 = vmatprep.mubr.bf16.mxu1 %v677_v29  ;;  %v613_v40 = vadd.f32 %v2063_v38, %v612_v36  ;;  %v1747_v41 = vpop.f32.mrb[10].mxu1 }
 0x10c   : > { %v560_v42 = vadd.f32 %v1731_v39, %v2063_v38  ;;  %v551_v43 = vpop.f32.mrb[11].mxu0  ;;  %1773 = vmatmul.mubr.bf16.gmra.mrb[20].mxu1 %v678_v27  ;;  %v669_v44 = vmax.f32 %v621_v35, 0.0  ;;  %v624_v45 = vadd.f32 %v1747_v41, %v2063_v38  ;;  %v615_v46 = vpop.f32.mrb[11].mxu1  ;;  %v653_v50 = vmax.f32 %v557_v33, 0.0 }
 0x10d   : > { %v552_v47 = vadd.f32 %v2063_v38, %v551_v43  ;;  %v667_v48 = vmax.f32 %v613_v40, 0.0  ;;  %v616_v49 = vadd.f32 %v2063_v38, %v615_v46  ;;  %v651_v53 = vmax.f32 %v549_v37, 0.0 }
 0x10e   : > { %v654_v51 = vmax.f32 %v560_v42, 0.0  ;;  %v670_v52 = vmax.f32 %v624_v45, 0.0 }
 0x10f   : > { %v652_v54 = vmax.f32 %v552_v47, 0.0  ;;  %v668_v55 = vmax.f32 %v616_v49, 0.0 }
 0x110   : > { %v680_v56 = vpack.c.bf16 %v654_v51, %v653_v50  ;;  %v688_v57 = vpack.c.bf16 %v670_v52, %v669_v44 }
 0x111   : > { %v679_v58 = vpack.c.bf16 %v652_v54, %v651_v53  ;;  %v1734_v59 = vpop.f32.mrb[12].mxu0  ;;  %v687_v60 = vpack.c.bf16 %v668_v55, %v667_v48  ;;  %v1750_v61 = vpop.f32.mrb[12].mxu1 }
 0x112   : > { %v573_v62 = vadd.f32 %v1734_v59, %v2063_v38  ;;  %v564_v63 = vpop.f32.mrb[13].mxu0  ;;  %v637_v1 = vadd.f32 %v1750_v61, %v2063_v38  ;;  %v628_v2 = vpop.f32.mrb[13].mxu1 }
 0x113   : > { %v565_v4 = vadd.f32 %v2063_v38, %v564_v63  ;;  %v1735_v5 = vpop.f32.mrb[14].mxu0  ;;  %1776 = vmatprep.mubr.bf16.mxu1 %v679_v58  ;;  %v629_v6 = vadd.f32 %v2063_v38, %v628_v2  ;;  %v1751_v7 = vpop.f32.mrb[14].mxu1 }
 0x114   : > { %v576_v8 = vadd.f32 %v1735_v5, %v2063_v38  ;;  %v567_v9 = vpop.f32.mrb[15].mxu0  ;;  %1777 = vmatmul.mubr.bf16.gmra.mrb[24].mxu1 %v680_v56  ;;  %v673_v10 = vmax.f32 %v637_v1, 0.0  ;;  %v640_v11 = vadd.f32 %v1751_v7, %v2063_v38  ;;  %v631_v12 = vpop.f32.mrb[15].mxu1  ;;  %v657_v16 = vmax.f32 %v573_v62, 0.0 }
 0x115   : > { %v568_v13 = vadd.f32 %v2063_v38, %v567_v9  ;;  %v671_v14 = vmax.f32 %v629_v6, 0.0  ;;  %v632_v15 = vadd.f32 %v2063_v38, %v631_v12  ;;  %v655_v19 = vmax.f32 %v565_v4, 0.0  ;;  %v1910_v38 = vld [vmem:[%s2220_s5 + $0x30] sm:$0xff]  }
 0x116   : > { %v658_v17 = vmax.f32 %v576_v8, 0.0  ;;  %v674_v18 = vmax.f32 %v640_v11, 0.0  ;;  %1812 = vmatprep.subr.bf16.mxu0 %v1910_v38 }
 0x117   : > { %v656_v20 = vmax.f32 %v568_v13, 0.0  ;;  %v672_v21 = vmax.f32 %v632_v15, 0.0  ;;  %1813 = vmatpush3.bf16.msra.mxu0 %v1910_v38 }
 0x118   : > { %v682_v22 = vpack.c.bf16 %v658_v17, %v657_v16  ;;  %v690_v23 = vpack.c.bf16 %v674_v18, %v673_v10 }
 0x119   : > { %v681_v24 = vpack.c.bf16 %v656_v20, %v655_v19  ;;  %v689_v25 = vpack.c.bf16 %v672_v21, %v671_v14 }
 0x11b   : > { %1780 = vmatprep.mubr.bf16.mxu1 %v681_v24 }
 0x11c   : > { %1781 = vmatmul.mubr.bf16.gmra.mrb[28].mxu1 %v682_v22 }
 0x11d   : > { %1784 = vmatprep.mubr.bf16.mxu1 %v2075_v3  ;;  %v1911_v3 = vld [vmem:[%s2220_s5 + $0x38] sm:$0xff]  }
 0x11e   : > { %1814 = vmatprep.subr.bf16.mxu0 %v1911_v3 }
 0x11f   : > { %1815 = vmatpush3.bf16.msra.mxu0 %v1911_v3 }
 0x124   : > { %1785 = vmatmul.mubr.bf16.gmra.mrb[32].mxu1 %v2073_v0  ;;  %v2118_v0 = vld [vmem:[%s2219_s4] ss:$0 sm:$0xff] }
 0x125   : > { %1788 = vmatprep.mubr.bf16.mxu1 %v2087_v31 }
 0x12c   : > { %1789 = vmatmul.mubr.bf16.gmra.mrb[36].mxu1 %v2085_v28 }
 0x12d   : > { %1792 = vmatprep.mubr.bf16.mxu1 %v687_v60 }
 0x134   : > { %1793 = vmatmul.mubr.bf16.gmra.mrb[40].mxu1 %v688_v57 }
 0x135   : > { %1796 = vmatprep.mubr.bf16.mxu1 %v689_v25 }
 0x13c   : > { %1797 = vmatmul.mubr.bf16.gmra.mrb[44].mxu1 %v690_v23 }
 0x1d7   : > { %v1770_v26 = vpop.f32.mrb[16].mxu1 }
 0x1d8   : > { %v805_v27 = vadd.f32 %v1770_v26, %v2118_v0  ;;  %v796_v28 = vpop.f32.mrb[17].mxu1 }
 0x1d9   : > { %v797_v29 = vadd.f32 %v2118_v0, %v796_v28  ;;  %v1771_v30 = vpop.f32.mrb[18].mxu1 }
 0x1da   : > { %v808_v31 = vadd.f32 %v1771_v30, %v2118_v0  ;;  %v799_v32 = vpop.f32.mrb[19].mxu1  ;;  %v925_v34 = vmax.f32 %v805_v27, 0.0 }
 0x1db   : > { %v800_v33 = vadd.f32 %v2118_v0, %v799_v32  ;;  %v923_v36 = vmax.f32 %v797_v29, 0.0 }
 0x1dc   : > { %v926_v35 = vmax.f32 %v808_v31, 0.0 }
 0x1dd   : > { %v924_v37 = vmax.f32 %v800_v33, 0.0 }
 0x1de   : > { %v956_v39 = vpack.c.bf16 %v926_v35, %v925_v34 }
 0x1df   : > { %v955_v40 = vpack.c.bf16 %v924_v37, %v923_v36  ;;  %v1774_v41 = vpop.f32.mrb[20].mxu1 }
 0x1e0   : > { %v821_v42 = vadd.f32 %v1774_v41, %v2118_v0  ;;  %v812_v43 = vpop.f32.mrb[21].mxu1 }
 0x1e1   : > { %v813_v44 = vadd.f32 %v2118_v0, %v812_v43  ;;  %v1775_v45 = vpop.f32.mrb[22].mxu1  ;;  %1816 = vmatprep.mubr.bf16.mxu0 %v955_v40 }
 0x1e2   : > { %v824_v46 = vadd.f32 %v1775_v45, %v2118_v0  ;;  %v815_v47 = vpop.f32.mrb[23].mxu1  ;;  %1817 = vmatmul.mubr.bf16.vlgmr.msra.gmra.mrb[16].mxu0 %v956_v39  ;;  %v929_v49 = vmax.f32 %v821_v42, 0.0 }
 0x1e3   : > { %v816_v48 = vadd.f32 %v2118_v0, %v815_v47  ;;  %v927_v51 = vmax.f32 %v813_v44, 0.0 }
 0x1e4   : > { %v930_v50 = vmax.f32 %v824_v46, 0.0 }
 0x1e5   : > { %v928_v52 = vmax.f32 %v816_v48, 0.0 }
 0x1e6   : > { %v958_v53 = vpack.c.bf16 %v930_v50, %v929_v49 }
 0x1e7   : > { %v957_v54 = vpack.c.bf16 %v928_v52, %v927_v51  ;;  %v1778_v55 = vpop.f32.mrb[24].mxu1 }
 0x1e8   : > { %v837_v56 = vadd.f32 %v1778_v55, %v2118_v0  ;;  %v828_v57 = vpop.f32.mrb[25].mxu1 }
 0x1e9   : > { %v829_v58 = vadd.f32 %v2118_v0, %v828_v57  ;;  %v1779_v59 = vpop.f32.mrb[26].mxu1  ;;  %1820 = vmatprep.mubr.bf16.mxu0 %v957_v54 }
 0x1ea   : > { %v840_v60 = vadd.f32 %v1779_v59, %v2118_v0  ;;  %v831_v61 = vpop.f32.mrb[27].mxu1  ;;  %1821 = vmatmul.mubr.bf16.gmra.mrb[20].mxu0 %v958_v53  ;;  %v933_v63 = vmax.f32 %v837_v56, 0.0 }
 0x1eb   : > { %v832_v62 = vadd.f32 %v2118_v0, %v831_v61  ;;  %v931_v2 = vmax.f32 %v829_v58, 0.0 }
 0x1ec   : > { %v934_v1 = vmax.f32 %v840_v60, 0.0 }
 0x1ed   : > { %v932_v4 = vmax.f32 %v832_v62, 0.0 }
 0x1ee   : > { %v960_v5 = vpack.c.bf16 %v934_v1, %v933_v63 }
 0x1ef   : > { %v959_v6 = vpack.c.bf16 %v932_v4, %v931_v2  ;;  %v1782_v7 = vpop.f32.mrb[28].mxu1 }
 0x1f0   : > { %v853_v8 = vadd.f32 %v1782_v7, %v2118_v0  ;;  %v844_v9 = vpop.f32.mrb[29].mxu1 }
 0x1f1   : > { %v845_v10 = vadd.f32 %v2118_v0, %v844_v9  ;;  %v1783_v11 = vpop.f32.mrb[30].mxu1  ;;  %1824 = vmatprep.mubr.bf16.mxu0 %v959_v6 }
 0x1f2   : > { %v856_v12 = vadd.f32 %v1783_v11, %v2118_v0  ;;  %v847_v13 = vpop.f32.mrb[31].mxu1  ;;  %1825 = vmatmul.mubr.bf16.gmra.mrb[24].mxu0 %v960_v5  ;;  %v937_v15 = vmax.f32 %v853_v8, 0.0 }
 0x1f3   : > { %v848_v14 = vadd.f32 %v2118_v0, %v847_v13  ;;  %v935_v17 = vmax.f32 %v845_v10, 0.0 }
 0x1f4   : > { %v938_v16 = vmax.f32 %v856_v12, 0.0 }
 0x1f5   : > { %v936_v18 = vmax.f32 %v848_v14, 0.0 }
 0x1f6   : > { %v962_v19 = vpack.c.bf16 %v938_v16, %v937_v15  ;;  %v2155_v15 = vld [vmem:[%s2221_s6] ss:$0 sm:$0xff] }
 0x1f7   : > { %v961_v20 = vpack.c.bf16 %v936_v18, %v935_v17  ;;  %v1786_v21 = vpop.f32.mrb[32].mxu1 }
 0x1f8   : > { %v869_v22 = vadd.f32 %v1786_v21, %v2118_v0  ;;  %v860_v23 = vpop.f32.mrb[33].mxu1 }
 0x1f9   : > { %v861_v24 = vadd.f32 %v2118_v0, %v860_v23  ;;  %v1787_v25 = vpop.f32.mrb[34].mxu1  ;;  %1828 = vmatprep.mubr.bf16.mxu0 %v961_v20 }
 0x1fa   : > { %v872_v38 = vadd.f32 %v1787_v25, %v2118_v0  ;;  %v863_v3 = vpop.f32.mrb[35].mxu1  ;;  %1829 = vmatmul.mubr.bf16.gmra.mrb[28].mxu0 %v962_v19  ;;  %v941_v27 = vmax.f32 %v869_v22, 0.0 }
 0x1fb   : > { %v864_v26 = vadd.f32 %v2118_v0, %v863_v3  ;;  %v939_v29 = vmax.f32 %v861_v24, 0.0 }
 0x1fc   : > { %v942_v28 = vmax.f32 %v872_v38, 0.0 }
 0x1fd   : > { %v940_v30 = vmax.f32 %v864_v26, 0.0 }
 0x1fe   : > { %v964_v31 = vpack.c.bf16 %v942_v28, %v941_v27 }
 0x1ff   : > { %v963_v32 = vpack.c.bf16 %v940_v30, %v939_v29  ;;  %v1790_v33 = vpop.f32.mrb[36].mxu1 }
 0x200   : > { %v885_v34 = vadd.f32 %v1790_v33, %v2118_v0  ;;  %v876_v35 = vpop.f32.mrb[37].mxu1 }
 0x201   : > { %v877_v36 = vadd.f32 %v2118_v0, %v876_v35  ;;  %v1791_v37 = vpop.f32.mrb[38].mxu1  ;;  %1832 = vmatprep.mubr.bf16.mxu0 %v963_v32 }
 0x202   : > { %v888_v39 = vadd.f32 %v1791_v37, %v2118_v0  ;;  %v879_v40 = vpop.f32.mrb[39].mxu1  ;;  %1833 = vmatmul.mubr.bf16.gmra.mrb[32].mxu0 %v964_v31  ;;  %v945_v42 = vmax.f32 %v885_v34, 0.0 }
 0x203   : > { %v880_v41 = vadd.f32 %v2118_v0, %v879_v40  ;;  %v943_v44 = vmax.f32 %v877_v36, 0.0 }
 0x204   : > { %v946_v43 = vmax.f32 %v888_v39, 0.0 }
 0x205   : > { %v944_v45 = vmax.f32 %v880_v41, 0.0 }
 0x206   : > { %v966_v46 = vpack.c.bf16 %v946_v43, %v945_v42 }
 0x207   : > { %v965_v47 = vpack.c.bf16 %v944_v45, %v943_v44  ;;  %v1794_v48 = vpop.f32.mrb[40].mxu1 }
 0x208   : > { %v901_v49 = vadd.f32 %v1794_v48, %v2118_v0  ;;  %v892_v50 = vpop.f32.mrb[41].mxu1 }
 0x209   : > { %v893_v51 = vadd.f32 %v2118_v0, %v892_v50  ;;  %v1795_v52 = vpop.f32.mrb[42].mxu1  ;;  %1836 = vmatprep.mubr.bf16.mxu0 %v965_v47 }
 0x20a   : > { %v904_v53 = vadd.f32 %v1795_v52, %v2118_v0  ;;  %v895_v54 = vpop.f32.mrb[43].mxu1  ;;  %1837 = vmatmul.mubr.bf16.gmra.mrb[36].mxu0 %v966_v46  ;;  %v949_v56 = vmax.f32 %v901_v49, 0.0 }
 0x20b   : > { %v896_v55 = vadd.f32 %v2118_v0, %v895_v54  ;;  %v947_v58 = vmax.f32 %v893_v51, 0.0 }
 0x20c   : > { %v950_v57 = vmax.f32 %v904_v53, 0.0 }
 0x20d   : > { %v948_v59 = vmax.f32 %v896_v55, 0.0 }
 0x20e   : > { %v968_v60 = vpack.c.bf16 %v950_v57, %v949_v56 }
 0x20f   : > { %v967_v61 = vpack.c.bf16 %v948_v59, %v947_v58  ;;  %v1798_v62 = vpop.f32.mrb[44].mxu1 }
 0x210   : > { %v917_v63 = vadd.f32 %v1798_v62, %v2118_v0  ;;  %v908_v1 = vpop.f32.mrb[45].mxu1 }
 0x211   : > { %v909_v2 = vadd.f32 %v2118_v0, %v908_v1  ;;  %v1799_v4 = vpop.f32.mrb[46].mxu1  ;;  %1840 = vmatprep.mubr.bf16.mxu0 %v967_v61 }
 0x212   : > { %v920_v5 = vadd.f32 %v1799_v4, %v2118_v0  ;;  %v911_v6 = vpop.f32.mrb[47].mxu1  ;;  %1841 = vmatmul.mubr.bf16.gmra.mrb[40].mxu0 %v968_v60  ;;  %v953_v8 = vmax.f32 %v917_v63, 0.0 }
 0x213   : > { %v912_v7 = vadd.f32 %v2118_v0, %v911_v6  ;;  %v951_v10 = vmax.f32 %v909_v2, 0.0 }
 0x214   : > { %v954_v9 = vmax.f32 %v920_v5, 0.0 }
 0x215   : > { %v952_v11 = vmax.f32 %v912_v7, 0.0 }
 0x216   : > { %v970_v12 = vpack.c.bf16 %v954_v9, %v953_v8 }
 0x217   : > { %v969_v13 = vpack.c.bf16 %v952_v11, %v951_v10 }
 0x219   : > { %1844 = vmatprep.mubr.bf16.mxu0 %v969_v13 }
 0x21a   : > { %1845 = vmatmul.mubr.bf16.gmra.mrb[44].mxu0 %v970_v12 }
 0x2b5   : > { %v1818_v14 = vpop.f32.mrb[16].mxu0 }
 0x2b6   : > { %v1076_v16 = vpop.f32.mrb[17].mxu0  ;;  %v1085_v18 = vadd.f32 %v1818_v14, %v2155_v15 }
 0x2b7   : > { %v1819_v17 = vpop.f32.mrb[18].mxu0  ;;  %v1077_v20 = vadd.f32 %v2155_v15, %v1076_v16 }
 0x2b8   : > { %v1088_v0 = vadd.f32 %v1819_v17, %v2155_v15  ;;  %v1079_v19 = vpop.f32.mrb[19].mxu0 }
 0x2b9   : > { %v1080_v21 = vadd.f32 %v2155_v15, %v1079_v19 }
 0x2ba   : > { %v1545_v22 = vpack.c.bf16 %v1088_v0, %v1085_v18 }
 0x2bb   : > { %v1540_v23 = vpack.c.bf16 %v1080_v21, %v1077_v20 }
 0x2bc   : > { %1617 = vst [vmem:[%s2165_s25 + $0x8] sm:$0xff] %v1545_v22  }
 0x2bd   : > { %1541 = vst [vmem:[%s2165_s25] sm:$0xff] %v1540_v23   ;;  %v1822_v24 = vpop.f32.mrb[20].mxu0 }
 0x2be   : > { %v1092_v25 = vpop.f32.mrb[21].mxu0  ;;  %v1101_v3 = vadd.f32 %v1822_v24, %v2155_v15 }
 0x2bf   : > { %v1823_v38 = vpop.f32.mrb[22].mxu0  ;;  %v1093_v28 = vadd.f32 %v2155_v15, %v1092_v25 }
 0x2c0   : > { %v1104_v26 = vadd.f32 %v1823_v38, %v2155_v15  ;;  %v1095_v27 = vpop.f32.mrb[23].mxu0 }
 0x2c1   : > { %v1096_v29 = vadd.f32 %v2155_v15, %v1095_v27 }
 0x2c2   : > { %v1555_v30 = vpack.c.bf16 %v1104_v26, %v1101_v3 }
 0x2c3   : > { %v1550_v31 = vpack.c.bf16 %v1096_v29, %v1093_v28 }
 0x2c4   : > { %1619 = vst [vmem:[%s2165_s25 + $0x18] sm:$0xff] %v1555_v30  }
 0x2c5   : > { %1618 = vst [vmem:[%s2165_s25 + $0x10] sm:$0xff] %v1550_v31   ;;  %v1826_v32 = vpop.f32.mrb[24].mxu0 }
 0x2c6   : > { %v1108_v33 = vpop.f32.mrb[25].mxu0  ;;  %v1117_v35 = vadd.f32 %v1826_v32, %v2155_v15 }
 0x2c7   : > { %v1827_v34 = vpop.f32.mrb[26].mxu0  ;;  %v1109_v39 = vadd.f32 %v2155_v15, %v1108_v33 }
 0x2c8   : > { %v1120_v36 = vadd.f32 %v1827_v34, %v2155_v15  ;;  %v1111_v37 = vpop.f32.mrb[27].mxu0 }
 0x2c9   : > { %v1112_v40 = vadd.f32 %v2155_v15, %v1111_v37 }
 0x2ca   : > { %v1565_v41 = vpack.c.bf16 %v1120_v36, %v1117_v35 }
 0x2cb   : > { %v1560_v42 = vpack.c.bf16 %v1112_v40, %v1109_v39 }
 0x2cc   : > { %1621 = vst [vmem:[%s2165_s25 + $0x28] sm:$0xff] %v1565_v41  }
 0x2cd   : > { %1620 = vst [vmem:[%s2165_s25 + $0x20] sm:$0xff] %v1560_v42   ;;  %v1830_v43 = vpop.f32.mrb[28].mxu0 }
 0x2ce   : > { %v1124_v44 = vpop.f32.mrb[29].mxu0  ;;  %v1133_v46 = vadd.f32 %v1830_v43, %v2155_v15 }
 0x2cf   : > { %v1831_v45 = vpop.f32.mrb[30].mxu0  ;;  %v1125_v49 = vadd.f32 %v2155_v15, %v1124_v44 }
 0x2d0   : > { %v1136_v47 = vadd.f32 %v1831_v45, %v2155_v15  ;;  %v1127_v48 = vpop.f32.mrb[31].mxu0 }
 0x2d1   : > { %v1128_v50 = vadd.f32 %v2155_v15, %v1127_v48 }
 0x2d2   : > { %v1575_v51 = vpack.c.bf16 %v1136_v47, %v1133_v46 }
 0x2d3   : > { %v1570_v52 = vpack.c.bf16 %v1128_v50, %v1125_v49 }
 0x2d4   : > { %1623 = vst [vmem:[%s2165_s25 + $0x38] sm:$0xff] %v1575_v51  }
 0x2d5   : > { %1622 = vst [vmem:[%s2165_s25 + $0x30] sm:$0xff] %v1570_v52   ;;  %v1834_v53 = vpop.f32.mrb[32].mxu0 }
 0x2d6   : > { %v1140_v54 = vpop.f32.mrb[33].mxu0  ;;  %v1149_v56 = vadd.f32 %v1834_v53, %v2155_v15 }
 0x2d7   : > { %v1835_v55 = vpop.f32.mrb[34].mxu0  ;;  %v1141_v59 = vadd.f32 %v2155_v15, %v1140_v54 }
 0x2d8   : > { %v1152_v57 = vadd.f32 %v1835_v55, %v2155_v15  ;;  %v1143_v58 = vpop.f32.mrb[35].mxu0 }
 0x2d9   : > { %v1144_v60 = vadd.f32 %v2155_v15, %v1143_v58 }
 0x2da   : > { %v1585_v61 = vpack.c.bf16 %v1152_v57, %v1149_v56 }
 0x2db   : > { %v1580_v62 = vpack.c.bf16 %v1144_v60, %v1141_v59 }
 0x2dc   : > { %1625 = vst [vmem:[%s2165_s25 + $0x48] sm:$0xff] %v1585_v61  }
 0x2dd   : > { %1624 = vst [vmem:[%s2165_s25 + $0x40] sm:$0xff] %v1580_v62   ;;  %v1838_v63 = vpop.f32.mrb[36].mxu0 }
 0x2de   : > { %v1156_v1 = vpop.f32.mrb[37].mxu0  ;;  %v1165_v4 = vadd.f32 %v1838_v63, %v2155_v15 }
 0x2df   : > { %v1839_v2 = vpop.f32.mrb[38].mxu0  ;;  %v1157_v7 = vadd.f32 %v2155_v15, %v1156_v1 }
 0x2e0   : > { %v1168_v5 = vadd.f32 %v1839_v2, %v2155_v15  ;;  %v1159_v6 = vpop.f32.mrb[39].mxu0 }
 0x2e1   : > { %v1160_v8 = vadd.f32 %v2155_v15, %v1159_v6 }
 0x2e2   : > { %v1595_v9 = vpack.c.bf16 %v1168_v5, %v1165_v4 }
 0x2e3   : > { %v1590_v10 = vpack.c.bf16 %v1160_v8, %v1157_v7 }
 0x2e4   : > { %1627 = vst [vmem:[%s2165_s25 + $0x58] sm:$0xff] %v1595_v9  }
 0x2e5   : > { %1626 = vst [vmem:[%s2165_s25 + $0x50] sm:$0xff] %v1590_v10   ;;  %v1842_v11 = vpop.f32.mrb[40].mxu0 }
 0x2e6   : > { %v1172_v12 = vpop.f32.mrb[41].mxu0  ;;  %v1181_v14 = vadd.f32 %v1842_v11, %v2155_v15 }
 0x2e7   : > { %v1843_v13 = vpop.f32.mrb[42].mxu0  ;;  %v1173_v18 = vadd.f32 %v2155_v15, %v1172_v12 }
 0x2e8   : > { %v1184_v16 = vadd.f32 %v1843_v13, %v2155_v15  ;;  %v1175_v17 = vpop.f32.mrb[43].mxu0 }
 0x2e9   : > { %v1176_v0 = vadd.f32 %v2155_v15, %v1175_v17 }
 0x2ea   : > { %v1605_v19 = vpack.c.bf16 %v1184_v16, %v1181_v14 }
 0x2eb   : > { %v1600_v20 = vpack.c.bf16 %v1176_v0, %v1173_v18 }
 0x2ec   : > { %1629 = vst [vmem:[%s2165_s25 + $0x68] sm:$0xff] %v1605_v19  }
 0x2ed   : > { %1628 = vst [vmem:[%s2165_s25 + $0x60] sm:$0xff] %v1600_v20   ;;  %v1846_v21 = vpop.f32.mrb[44].mxu0 }
 0x2ee   : > { %v1188_v22 = vpop.f32.mrb[45].mxu0  ;;  %v1197_v24 = vadd.f32 %v1846_v21, %v2155_v15 }
 0x2ef   : > { %v1847_v23 = vpop.f32.mrb[46].mxu0  ;;  %v1189_v3 = vadd.f32 %v2155_v15, %v1188_v22 }
 0x2f0   : > { %v1200_v25 = vadd.f32 %v1847_v23, %v2155_v15  ;;  %v1191_v38 = vpop.f32.mrb[47].mxu0 }
 0x2f1   : > { %v1192_v26 = vadd.f32 %v2155_v15, %v1191_v38 }
 0x2f2   : > { %v1615_v27 = vpack.c.bf16 %v1200_v25, %v1197_v24 }
 0x2f3   : > { %v1610_v28 = vpack.c.bf16 %v1192_v26, %v1189_v3 }
 0x2f4   : > { %1631 = vst [vmem:[%s2165_s25 + $0x78] sm:$0xff] %v1615_v27  }
 0x2f5   : > { %1630 = vst [vmem:[%s2165_s25 + $0x70] sm:$0xff] %v1610_v28  }
 0x2f6 PF: > { %s17_s24 = sadd.s32 1, %s1918_s24  }
 0x2f7   : > { %p14_p4 = scmp.ge.s32.totalorder %s17_s24, 4  }
 0x2f9   :  { %16 = sbr.rel (!%p14_p4) target bundleno = 1 (0x1), region = 78 }

</bundles_post_ra>
